<compile_context>
chip_gen: v5e
topology: v5e:2x2
jax: 0.10.0
libtpu: 0.0.40
codegen_flags: <defaults>
</compile_context>

<pallas_src>
import functools

import jax
import jax.numpy as jnp
from jax.experimental import pallas as pl
from jax.experimental.pallas import tpu as pltpu


def _round_up(x, m):
    return (x + m - 1) // m * m


def _cdiv(a, b):
    return -(-a // b)


def net_kernel(x_ref, w1_ref, b1_ref, w2_ref, b2_ref, out_ref, h_ref):
    # x_ref:  (TB, K)  f32     w1_ref: (K, H)  bf16    b1_ref: (1, H) f32
    # w2_ref: (H, C)   bf16    b2_ref: (1, C)  f32
    # out_ref: (TB, C) f32     h_ref:  (TB, H) bf16
    x = x_ref[...].astype(jnp.bfloat16)          # in-kernel cast: no extra HBM pass
    # fc1 (no activation in the reference forward), f32 accumulation on MXU
    h = jnp.dot(x, w1_ref[...], preferred_element_type=jnp.float32) + b1_ref[...]
    h_bf = h.astype(jnp.bfloat16)
    h_ref[...] = h_bf                            # bf16 writeback (half the bytes)
    # fc2 consumes the same bf16 h it writes back
    out = jnp.dot(h_bf, w2_ref[...], preferred_element_type=jnp.float32) + b2_ref[...]
    out_ref[...] = out.astype(out_ref.dtype)


def prepare_params(w1, b1, w2, b2):
    """One-time parameter packing (do NOT call per forward step).

    w1: (hidden, 900) ; b1: (hidden,) ; w2: (num_classes, hidden) ; b2: (num_classes,)
    Weights are stored (in, out) in bf16 for the MXU; biases stay f32.
    No lane padding: outputs are written unpadded.
    """
    w1t = jnp.transpose(w1).astype(jnp.bfloat16)        # (900, hidden)
    b1r = b1.astype(jnp.float32).reshape(1, -1)         # (1, hidden)
    w2t = jnp.transpose(w2).astype(jnp.bfloat16)        # (hidden, num_classes)
    b2r = b2.astype(jnp.float32).reshape(1, -1)         # (1, num_classes)
    return (w1t, b1r, w2t, b2r)


@functools.partial(jax.jit, static_argnames=("max_batch_tile",))
def net_forward(x, params, *, max_batch_tile=2048):
    """x: (B, C, H, W) with C*H*W == 900 (flattened row-major like torch .view).

    Returns (output, hidden) == (fc2(fc1(x)), fc1(x)); hidden is bf16.
    """
    w1t, b1r, w2t, b2r = params
    B = x.shape[0]
    xf = x.reshape(B, -1)                     # keep f32; cast happens in-kernel
    K = xf.shape[1]
    H = w1t.shape[1]
    C = w2t.shape[1]

    # --- batch tiling ------------------------------------------------------
    # Small batch: one block covering the whole batch (block == full dim).
    # Larger batch: >=2 tiles (megacore on v7x), tile rows a multiple of 8,
    # so any padding is at most a few rows per tile (cheap jnp.pad).
    if B < 256:
        TB = B
        B_pad = B
    else:
        num_tiles = max(2, _cdiv(B, max_batch_tile))
        TB = _round_up(_cdiv(B, num_tiles), 8)
        B_pad = _round_up(B, TB)
    if B_pad != B:
        xf = jnp.pad(xf, ((0, B_pad - B), (0, 0)))
    grid = (B_pad // TB,)

    flops = 2 * B_pad * (K * H + H * C)
    bytes_accessed = (B_pad * K * 4                      # x (f32, read once)
                      + K * H * 2 + H * 4                # w1 bf16 + b1 f32
                      + H * C * 2 + C * 4                # w2 bf16 + b2 f32
                      + B_pad * H * 2                    # hidden out (bf16)
                      + B_pad * C * 4)                   # class out (f32)

    out_p, h_p = pl.pallas_call(
        net_kernel,
        grid=grid,
        in_specs=[
            pl.BlockSpec((TB, K), lambda i: (i, 0)),     # x streams with the grid
            pl.BlockSpec((K, H), lambda i: (0, 0)),      # weights/biases VMEM-resident
            pl.BlockSpec((1, H), lambda i: (0, 0)),
            pl.BlockSpec((H, C), lambda i: (0, 0)),
            pl.BlockSpec((1, C), lambda i: (0, 0)),
        ],
        out_specs=(
            pl.BlockSpec((TB, C), lambda i: (i, 0)),
            pl.BlockSpec((TB, H), lambda i: (i, 0)),
        ),
        out_shape=(
            jax.ShapeDtypeStruct((B_pad, C), jnp.float32),
            jax.ShapeDtypeStruct((B_pad, H), jnp.bfloat16),
        ),
        compiler_params=pltpu.CompilerParams(
            dimension_semantics=("parallel",),
            vmem_limit_bytes=56 * 1024 * 1024),
        cost_estimate=pl.CostEstimate(
            flops=flops, transcendentals=0, bytes_accessed=bytes_accessed),
    )(xf, w1t, b1r, w2t, b2r)

    if B_pad != B:
        out_p = out_p[:B]
        h_p = h_p[:B]
    return out_p, h_p


def init_linear(key, out_features, in_features):
    """Deterministic init matching torch.nn.Linear default (uniform +/- 1/sqrt(in))."""
    kw, kb = jax.random.split(key)
    bound = 1.0 / jnp.sqrt(jnp.float32(in_features))
    w = jax.random.uniform(kw, (out_features, in_features), jnp.float32, -bound, bound)
    b = jax.random.uniform(kb, (out_features,), jnp.float32, -bound, bound)
    return w, b


if __name__ == "__main__":
    # Small, forward-consistent shapes: 900 input features <- (1, 30, 30)
    B = 2
    HIDDEN = 32          # the `weight` constructor arg
    NUM_CLASSES = 10

    key = jax.random.PRNGKey(0)
    kx, k1, k2 = jax.random.split(key, 3)

    x = jax.random.normal(kx, (B, 1, 30, 30), jnp.float32)   # NCHW, flattens to 900
    w1, b1 = init_linear(k1, HIDDEN, 900)
    w2, b2 = init_linear(k2, NUM_CLASSES, HIDDEN)

    # One-time parameter packing (transpose/cast hoisted out of forward).
    params = jax.block_until_ready(prepare_params(w1, b1, w2, b2))

    out, h = net_forward(x, params)
    jax.block_until_ready((out, h))

    # Pure-JAX f32 reference (tolerances cover bf16 matmul operands / bf16 h).
    xf = x.reshape(B, -1)
    h_ref = xf @ w1.T + b1
    out_ref = h_ref @ w2.T + b2
    assert out.shape == (B, NUM_CLASSES) and h.shape == (B, HIDDEN)
    assert jnp.allclose(h.astype(jnp.float32), h_ref, atol=5e-2, rtol=5e-2), "hidden mismatch"
    assert jnp.allclose(out, out_ref, atol=5e-2, rtol=5e-2), "output mismatch"

    # Also exercise the multi-tile + ragged-batch path (>=2 grid steps, tiny pad).
    B2 = 260
    x2 = jax.random.normal(jax.random.PRNGKey(1), (B2, 1, 30, 30), jnp.float32)
    out2, h2 = net_forward(x2, params)
    jax.block_until_ready((out2, h2))
    xf2 = x2.reshape(B2, -1)
    h2_ref = xf2 @ w1.T + b1
    out2_ref = h2_ref @ w2.T + b2
    assert out2.shape == (B2, NUM_CLASSES) and h2.shape == (B2, HIDDEN)
    assert jnp.allclose(h2.astype(jnp.float32), h2_ref, atol=5e-2, rtol=5e-2), "hidden mismatch (tiled)"
    assert jnp.allclose(out2, out2_ref, atol=5e-2, rtol=5e-2), "output mismatch (tiled)"

    print("KERNEL_OK")
</pallas_src>

<mosaic_0001>
module attributes {stable_mosaic.version = 11 : i64} {
  func.func @net_kernel(%arg0: i32, %arg1: memref<2x900xf32, #tpu.memory_space<vmem>>, %arg2: memref<900x32xbf16, #tpu.memory_space<vmem>>, %arg3: memref<1x32xf32, #tpu.memory_space<vmem>>, %arg4: memref<32x10xbf16, #tpu.memory_space<vmem>>, %arg5: memref<1x10xf32, #tpu.memory_space<vmem>>, %arg6: memref<2x10xf32, #tpu.memory_space<vmem>>, %arg7: memref<2x32xbf16, #tpu.memory_space<vmem>>) attributes {dimension_semantics = [#tpu.dimension_semantics<parallel>], iteration_bounds = array<i64: 1>, scalar_prefetch = 0 : i64, scratch_operands = 0 : i64, tpu.core_type = #tpu.core_type<tc>, window_params = [{transform_indices = @transform_0, window_bounds = array<i64: 2, 900>}, {pipeline_mode = #tpu.pipeline_mode<synchronous>, transform_indices = @transform_1, window_bounds = array<i64: 900, 32>}, {pipeline_mode = #tpu.pipeline_mode<synchronous>, transform_indices = @transform_2, window_bounds = array<i64: 1, 32>}, {pipeline_mode = #tpu.pipeline_mode<synchronous>, transform_indices = @transform_3, window_bounds = array<i64: 32, 10>}, {pipeline_mode = #tpu.pipeline_mode<synchronous>, transform_indices = @transform_4, window_bounds = array<i64: 1, 10>}, {transform_indices = @transform_5, window_bounds = array<i64: 2, 10>}, {transform_indices = @transform_6, window_bounds = array<i64: 2, 32>}]} {
    %c0 = arith.constant 0 : index
    %c0_0 = arith.constant 0 : index
    %0 = vector.load %arg1[%c0, %c0_0] : memref<2x900xf32, #tpu.memory_space<vmem>>, vector<2x900xf32>
    %1 = arith.truncf %0 : vector<2x900xf32> to vector<2x900xbf16>
    %c0_1 = arith.constant 0 : index
    %c0_2 = arith.constant 0 : index
    %2 = vector.load %arg2[%c0_1, %c0_2] : memref<900x32xbf16, #tpu.memory_space<vmem>>, vector<900x32xbf16>
    %cst = arith.constant dense<0.000000e+00> : vector<2x32xf32>
    %3 = tpu.matmul %1, %2, %cst {dimension_numbers = #tpu.dot_dimension_numbers<[1], [0], [0], [1], [0, 0, 1, 1], [], []>} : vector<2x900xbf16>, vector<900x32xbf16>, vector<2x32xf32> -> vector<2x32xf32>
    %c0_3 = arith.constant 0 : index
    %c0_4 = arith.constant 0 : index
    %4 = vector.load %arg3[%c0_3, %c0_4] : memref<1x32xf32, #tpu.memory_space<vmem>>, vector<1x32xf32>
    %5 = vector.broadcast %4 : vector<1x32xf32> to vector<2x32xf32>
    %6 = arith.addf %3, %5 : vector<2x32xf32>
    %7 = arith.truncf %6 : vector<2x32xf32> to vector<2x32xbf16>
    %c0_5 = arith.constant 0 : index
    %c0_6 = arith.constant 0 : index
    %8 = vector.load %arg7[%c0_5, %c0_6] : memref<2x32xbf16, #tpu.memory_space<vmem>>, vector<2x32xbf16>
    tpu.vector_store %arg7[%c0_5, %c0_6], %7 {strides = array<i32>} : memref<2x32xbf16, #tpu.memory_space<vmem>>, vector<2x32xbf16>,
    %c0_7 = arith.constant 0 : index
    %c0_8 = arith.constant 0 : index
    %9 = vector.load %arg4[%c0_7, %c0_8] : memref<32x10xbf16, #tpu.memory_space<vmem>>, vector<32x10xbf16>
    %cst_9 = arith.constant dense<0.000000e+00> : vector<2x10xf32>
    %10 = tpu.matmul %7, %9, %cst_9 {dimension_numbers = #tpu.dot_dimension_numbers<[1], [0], [0], [1], [0, 0, 1, 1], [], []>} : vector<2x32xbf16>, vector<32x10xbf16>, vector<2x10xf32> -> vector<2x10xf32>
    %c0_10 = arith.constant 0 : index
    %c0_11 = arith.constant 0 : index
    %11 = vector.load %arg5[%c0_10, %c0_11] : memref<1x10xf32, #tpu.memory_space<vmem>>, vector<1x10xf32>
    %12 = vector.broadcast %11 : vector<1x10xf32> to vector<2x10xf32>
    %13 = arith.addf %10, %12 : vector<2x10xf32>
    %c0_12 = arith.constant 0 : index
    %c0_13 = arith.constant 0 : index
    %14 = vector.load %arg6[%c0_12, %c0_13] : memref<2x10xf32, #tpu.memory_space<vmem>>, vector<2x10xf32>
    tpu.vector_store %arg6[%c0_12, %c0_13], %13 {strides = array<i32>} : memref<2x10xf32, #tpu.memory_space<vmem>>, vector<2x10xf32>,
    return
  }
  func.func @transform_0(%arg0: i32) -> (i32, i32) {
    %c0_i32 = arith.constant 0 : i32
    %c0_i32_0 = arith.constant 0 : i32
    return %arg0, %c0_i32 : i32, i32
  }
  func.func @transform_1(%arg0: i32) -> (i32, i32) {
    %c0_i32 = arith.constant 0 : i32
    %c0_i32_0 = arith.constant 0 : i32
    %c0_i32_1 = arith.constant 0 : i32
    return %c0_i32, %c0_i32_0 : i32, i32
  }
  func.func @transform_2(%arg0: i32) -> (i32, i32) {
    %c0_i32 = arith.constant 0 : i32
    %c0_i32_0 = arith.constant 0 : i32
    %c0_i32_1 = arith.constant 0 : i32
    return %c0_i32, %c0_i32_0 : i32, i32
  }
  func.func @transform_3(%arg0: i32) -> (i32, i32) {
    %c0_i32 = arith.constant 0 : i32
    %c0_i32_0 = arith.constant 0 : i32
    %c0_i32_1 = arith.constant 0 : i32
    return %c0_i32, %c0_i32_0 : i32, i32
  }
  func.func @transform_4(%arg0: i32) -> (i32, i32) {
    %c0_i32 = arith.constant 0 : i32
    %c0_i32_0 = arith.constant 0 : i32
    %c0_i32_1 = arith.constant 0 : i32
    return %c0_i32, %c0_i32_0 : i32, i32
  }
  func.func @transform_5(%arg0: i32) -> (i32, i32) {
    %c0_i32 = arith.constant 0 : i32
    %c0_i32_0 = arith.constant 0 : i32
    return %arg0, %c0_i32 : i32, i32
  }
  func.func @transform_6(%arg0: i32) -> (i32, i32) {
    %c0_i32 = arith.constant 0 : i32
    %c0_i32_0 = arith.constant 0 : i32
    return %arg0, %c0_i32 : i32, i32
  }
}

</mosaic_0001>

<bundles_post_ra>
// kernel: net_forward.1
= control target key start
LH: loop header
LB: loop body
LE: loop exit
PB: predicated region body
PF: predicated region fallthrough
CT: control target
= control target key end

     0   :  { %12 = vsyncpa [#allocation3], 0  ;;  %s1278_s0 = inlined_call_operand.vmem [shape: f32[2,900], index: 0, kind: input, shape index: {}]   ;;  %s1279_s1 = inlined_call_operand.vmem [shape: bf16[900,32], index: 1, kind: input, shape index: {}]   ;;  %s1280_s2 = inlined_call_operand.vmem [shape: f32[1,32], index: 2, kind: input, shape index: {}]   ;;  %s1281_s3 = inlined_call_operand.vmem [shape: bf16[32,10], index: 3, kind: input, shape index: {}]   ;;  %s1282_s4 = inlined_call_operand.vmem [shape: f32[1,10], index: 4, kind: input, shape index: {}]   ;;  %s1283_s5 = inlined_call_operand.hbm [shape: f32[2,10], index: 5, kind: output, shape index: {0}]   ;;  %s1284_s6 = inlined_call_operand.hbm [shape: bf16[2,32], index: 6, kind: output, shape index: {1}]  }
   0x1   :  { %v939_v0 = vld [vmem:[%s1279_s1 + $0x38] sm:$0xff]  ;;  %v938_v3 = vld [vmem:[%s1279_s1 + $0x30] sm:$0xff]  ;;  %v937_v8 = vld [vmem:[%s1279_s1 + $0x28] sm:$0xff] }
   0x2   :  { %v947_v1 = vld [vmem:[%s1279_s1 + $0x78] sm:$0xff]  ;;  %520 = vmatpush.bf16.msra.mxu0 %v939_v0  ;;  %v946_v4 = vld [vmem:[%s1279_s1 + $0x70] sm:$0xff]  ;;  %v945_v9 = vld [vmem:[%s1279_s1 + $0x68] sm:$0xff] }
   0x3   :  { %v955_v2 = vld [vmem:[%s1279_s1 + $0xb8] sm:$0xff]  ;;  %533 = vmatpush.bf16.msra.mxu1 %v947_v1  ;;  %v954_v6 = vld [vmem:[%s1279_s1 + $0xb0] sm:$0xff]  ;;  %v953_v10 = vld [vmem:[%s1279_s1 + $0xa8] sm:$0xff] }
   0x4   :  { %v963_v5 = vld [vmem:[%s1279_s1 + $0xf8] sm:$0xff]  ;;  %546 = vmatpush.bf16.msra.mxu2 %v955_v2  ;;  %v962_v7 = vld [vmem:[%s1279_s1 + $0xf0] sm:$0xff]  ;;  %v961_v11 = vld [vmem:[%s1279_s1 + $0xe8] sm:$0xff] }
   0x5   :  { %559 = vmatpush.bf16.msra.mxu3 %v963_v5  ;;  %v936_v12 = vld [vmem:[%s1279_s1 + $0x20] sm:$0xff]  ;;  %v935_v17 = vld [vmem:[%s1279_s1 + $0x18] sm:$0xff]  ;;  %v26_v21 = vld [vmem:[%s1278_s0 + $0x8] sm:$0xff] }
   0x6   :  { %521 = vmatpush.bf16.msra.mxu0 %v938_v3  ;;  %v944_v13 = vld [vmem:[%s1279_s1 + $0x60] sm:$0xff]  ;;  %v943_v18 = vld [vmem:[%s1279_s1 + $0x58] sm:$0xff]  ;;  %31 = vst [vmem:[#allocation1 + $0x20] ss:$4 sm:$0xff] %v26_v21  ;;  %v934_v22 = vld [vmem:[%s1279_s1 + $0x10] sm:$0xff] }
   0x7   :  { %534 = vmatpush.bf16.msra.mxu1 %v946_v4  ;;  %v952_v14 = vld [vmem:[%s1279_s1 + $0xa0] sm:$0xff]  ;;  %v951_v19 = vld [vmem:[%s1279_s1 + $0x98] sm:$0xff]  ;;  %v942_v23 = vld [vmem:[%s1279_s1 + $0x50] sm:$0xff] }
   0x8   :  { %547 = vmatpush.bf16.msra.mxu2 %v954_v6  ;;  %v960_v15 = vld [vmem:[%s1279_s1 + $0xe0] sm:$0xff]  ;;  %v959_v20 = vld [vmem:[%s1279_s1 + $0xd8] sm:$0xff] }
   0x9   :  { %560 = vmatpush.bf16.msra.mxu3 %v962_v7  ;;  %v25_v16 = vld [vmem:[%s1278_s0] sm:$0xff] }
   0xa   :  { %522 = vmatpush.bf16.msra.mxu0 %v937_v8  ;;  %29 = vst [vmem:[#allocation1] ss:$4 sm:$0xff] %v25_v16 }
   0xb   :  { %535 = vmatpush.bf16.msra.mxu1 %v945_v9 }
   0xc   :  { %548 = vmatpush.bf16.msra.mxu2 %v953_v10 }
   0xd   :  { %561 = vmatpush.bf16.msra.mxu3 %v961_v11 }
   0xe   :  { %523 = vmatpush.bf16.msra.mxu0 %v936_v12 }
   0xf   :  { %536 = vmatpush.bf16.msra.mxu1 %v944_v13 }
  0x10   :  { %549 = vmatpush.bf16.msra.mxu2 %v952_v14 }
  0x11   :  { %562 = vmatpush.bf16.msra.mxu3 %v960_v15 }
  0x12   :  { %524 = vmatpush.bf16.msra.mxu0 %v935_v17 }
  0x13   :  { %537 = vmatpush.bf16.msra.mxu1 %v943_v18 }
  0x14   :  { %13 = vsyncpa [#allocation5], 0  ;;  %550 = vmatpush.bf16.msra.mxu2 %v951_v19  ;;  %v950_v24 = vld [vmem:[%s1279_s1 + $0x90] sm:$0xff]  ;;  %v168_v26 = vld [vmem:[%s1279_s1 + $0x1c0] sm:$0x3]  ;;  %vm516_vm0 = vcmask 1041408  }
  0x15   :  { %563 = vmatpush.bf16.msra.mxu3 %v959_v20  ;;  %v958_v25 = vld [vmem:[%s1279_s1 + $0xd0] sm:$0xff]  ;;  %v933_v27 = vld [vmem:[%s1279_s1 + $0x8] sm:$0xff]  ;;  %v398_v31 = vunpack.c.l.b16 %v168_v26  ;;  %v932_v32 = vld [vmem:[%s1279_s1] sm:$0xff]  ;;  %vm512_vm1 = vcmask 31744   ;;  %vm647_vm2 = vcmask 261120   ;;  %vm625_vm3 = vcmask 253952  }
  0x16   :  { %525 = vmatpush.bf16.msra.mxu0 %v934_v22  ;;  %v941_v28 = vld [vmem:[%s1279_s1 + $0x48] sm:$0xff]  ;;  %v940_v33 = vld [vmem:[%s1279_s1 + $0x40] sm:$0xff]  ;;  %v971_v35 = vld [vmem:[%s1279_s1 + $0x138] sm:$0xff]  ;;  %s684_s23 = sshll.u32 %s1284_s6, 4  ;;  %s1047_s25 = smov [#allocation2]   ;;  %vm664_vm4 = vcmask 74752   ;;  %s685_s23 = int_to_ptr.hbm [resolvable:$true] %s684_s23 }
  0x17   :  { %538 = vmatpush.bf16.msra.mxu1 %v942_v23  ;;  %v949_v29 = vld [vmem:[%s1279_s1 + $0x88] sm:$0xff]  ;;  %v948_v34 = vld [vmem:[%s1279_s1 + $0x80] sm:$0xff]  ;;  %v34_v37 = vld.sshfl [vmem:[#allocation1 + $0x10] sm:$0xff pattern:$0x73625140]  ;;  %v455_v41 = vpack.c.b16 %v398_v31, %v398_v31  ;;  %s671_s26 = sshll.u32 %s1047_s25, 4  ;;  %s672_s26 = int_to_ptr.vmem [resolvable:$true] %s671_s26 }
  0x18   :  { %551 = vmatpush.bf16.msra.mxu2 %v950_v24  ;;  %v957_v30 = vld [vmem:[%s1279_s1 + $0xc8] sm:$0xff]  ;;  %v32_v36 = vld.sshfl [vmem:[#allocation1] sm:$0xff pattern:$0x73625140]  ;;  %v979_v39 = vld [vmem:[%s1279_s1 + $0x178] sm:$0xff]  ;;  %v50_v44 = vpack.c.bf16 %v34_v37, %v34_v37  ;;  %s673_s29 = sshll.u32 %s1283_s5, 4  ;;  %s674_s29 = int_to_ptr.hbm [resolvable:$true] %s673_s29 }
  0x19   :  { %564 = vmatpush.bf16.msra.mxu3 %v958_v25  ;;  %v33_v38 = vld.sshfl [vmem:[#allocation1 + $0x8] sm:$0xff pattern:$0x73625140]  ;;  %v987_v40 = vld [vmem:[%s1279_s1 + $0x1b8] sm:$0xff]  ;;  %v956_v42 = vld [vmem:[%s1279_s1 + $0xc0] sm:$0xff]  ;;  %v48_v43 = vpack.c.bf16 %v32_v36, %v32_v36  ;;  %v518_v50 = vsel %vm516_vm0, %v455_v41, 0 }
  0x1a   :  { %526 = vmatpush.bf16.msra.mxu0 %v933_v27  ;;  %v35_v45 = vld.sshfl [vmem:[#allocation1 + $0x18] sm:$0xff pattern:$0x73625140]  ;;  %v49_v46 = vpack.c.bf16 %v33_v38, %v33_v38  ;;  %v970_v47 = vld [vmem:[%s1279_s1 + $0x130] sm:$0xff]  ;;  %v969_v52 = vld [vmem:[%s1279_s1 + $0x128] sm:$0xff] }
  0x1b   :  { %539 = vmatpush.bf16.msra.mxu1 %v941_v28  ;;  %v978_v48 = vld [vmem:[%s1279_s1 + $0x170] sm:$0xff]  ;;  %v51_v51 = vpack.c.bf16 %v35_v45, %v35_v45  ;;  %v977_v53 = vld [vmem:[%s1279_s1 + $0x168] sm:$0xff]  ;;  %v968_v55 = vld [vmem:[%s1279_s1 + $0x120] sm:$0xff] }
  0x1c   :  { %552 = vmatpush.bf16.msra.mxu2 %v949_v29  ;;  %v986_v49 = vld [vmem:[%s1279_s1 + $0x1b0] sm:$0xff]  ;;  %v985_v54 = vld [vmem:[%s1279_s1 + $0x1a8] sm:$0xff]  ;;  %v976_v56 = vld [vmem:[%s1279_s1 + $0x160] sm:$0xff] }
  0x1d   :  { %565 = vmatpush.bf16.msra.mxu3 %v957_v30  ;;  %v984_v57 = vld [vmem:[%s1279_s1 + $0x1a0] sm:$0xff]  ;;  %v967_v58 = vld [vmem:[%s1279_s1 + $0x118] sm:$0xff]  ;;  %v966_v62 = vld [vmem:[%s1279_s1 + $0x110] sm:$0xff] }
  0x1e   :  { %527 = vmatpush.bf16.msra.mxu0 %v932_v32  ;;  %v975_v59 = vld [vmem:[%s1279_s1 + $0x158] sm:$0xff]  ;;  %v974_v63 = vld [vmem:[%s1279_s1 + $0x150] sm:$0xff]  ;;  %v965_v2 = vld [vmem:[%s1279_s1 + $0x108] sm:$0xff] }
  0x1f   :  { %540 = vmatpush.bf16.msra.mxu1 %v940_v33  ;;  %v983_v60 = vld [vmem:[%s1279_s1 + $0x198] sm:$0xff]  ;;  %v982_v0 = vld [vmem:[%s1279_s1 + $0x190] sm:$0xff]  ;;  %v973_v3 = vld [vmem:[%s1279_s1 + $0x148] sm:$0xff] }
  0x20   :  { %553 = vmatpush.bf16.msra.mxu2 %v948_v34  ;;  %v39_v61 = vld.sshfl [vmem:[#allocation1 + $0x38] sm:$0xff pattern:$0x73625140]  ;;  %v981_v4 = vld [vmem:[%s1279_s1 + $0x188] sm:$0xff]  ;;  %v964_v5 = vld [vmem:[%s1279_s1 + $0x100] sm:$0xff] }
  0x21   :  { %566 = vmatpush.bf16.msra.mxu3 %v956_v42  ;;  %528 = vmatmul.bf16.vlgmr.msra.gmra.mxu0 %v48_v43  ;;  %v55_v1 = vpack.c.bf16 %v39_v61, %v39_v61  ;;  %v972_v6 = vld [vmem:[%s1279_s1 + $0x140] sm:$0xff]  ;;  %v37_v9 = vld.sshfl [vmem:[#allocation1 + $0x28] sm:$0xff pattern:$0x73625140] }
  0x22   :  { %572 = vmatpush.bf16.msrb.mxu0 %v971_v35  ;;  %541 = vmatmul.bf16.vlgmr.msra.gmra.mxu1 %v49_v46  ;;  %v980_v7 = vld [vmem:[%s1279_s1 + $0x180] sm:$0xff]  ;;  %v38_v10 = vld.sshfl [vmem:[#allocation1 + $0x30] sm:$0xff pattern:$0x73625140]  ;;  %v53_v12 = vpack.c.bf16 %v37_v9, %v37_v9  ;;  %v989_v14 = vld [vmem:[%s1281_s3 + $0x8] sm:$0xff] }
  0x23   :  { %585 = vmatpush.bf16.msrb.mxu1 %v979_v39  ;;  %554 = vmatmul.bf16.vlgmr.msra.gmra.mxu2 %v50_v44  ;;  %v36_v8 = vld.sshfl [vmem:[#allocation1 + $0x20] sm:$0xff pattern:$0x73625140]  ;;  %v54_v13 = vpack.c.bf16 %v38_v10, %v38_v10 }
  0x24   :  { %598 = vmatpush.bf16.msrb.mxu2 %v987_v40  ;;  %567 = vmatmul.bf16.vlgmr.msra.gmra.mxu3 %v51_v51  ;;  %v52_v11 = vpack.c.bf16 %v36_v8, %v36_v8  ;;  %v988_v16 = vld [vmem:[%s1281_s3] sm:$0xff] }
  0x25   :  { %618 = vmatpush.bf16.msrb.mxu3 %v518_v50  ;;  %v992_v22 = vld [vmem:[%s1280_s2] ss:$0 sm:$0xff]  ;;  %s1046_s2 = smov [#allocation4]  }
  0x26   :  { %573 = vmatpush.bf16.msrb.mxu0 %v970_v47  ;;  %s682_s3 = sshll.u32 %s1046_s2, 4  ;;  %v993_v42 = vld [vmem:[%s1282_s4] ss:$0 sm:$0xff]  ;;  %s683_s3 = int_to_ptr.vmem [resolvable:$true] %s682_s3 }
  0x27   :  { %586 = vmatpush.bf16.msrb.mxu1 %v978_v48 }
  0x28   :  { %599 = vmatpush.bf16.msrb.mxu2 %v986_v49 }
  0x29   :  { %657 = vmatpush.bf16.msra.mxu3 %v989_v14 }
  0x2a   :  { %574 = vmatpush.bf16.msrb.mxu0 %v969_v52 }
  0x2b   :  { %587 = vmatpush.bf16.msrb.mxu1 %v977_v53 }
  0x2c   :  { %600 = vmatpush.bf16.msrb.mxu2 %v985_v54 }
  0x2d   :  { %658 = vmatpush.bf16.msra.mxu3 %v988_v16 }
  0x2e   :  { %575 = vmatpush.bf16.msrb.mxu0 %v968_v55 }
  0x2f   :  { %588 = vmatpush.bf16.msrb.mxu1 %v976_v56 }
  0x30   :  { %601 = vmatpush.bf16.msrb.mxu2 %v984_v57 }
  0x32   :  { %576 = vmatpush.bf16.msrb.mxu0 %v967_v58 }
  0x33   :  { %589 = vmatpush.bf16.msrb.mxu1 %v975_v59 }
  0x34   :  { %602 = vmatpush.bf16.msrb.mxu2 %v983_v60  ;;  %922 = vmatmul.msk.bf16.vlgmr.msrb.gmra.mxu3 %vm512_vm1, %v55_v1 }
  0x36   :  { %577 = vmatpush.bf16.msrb.mxu0 %v966_v62 }
  0x37   :  { %590 = vmatpush.bf16.msrb.mxu1 %v974_v63 }
  0x38   :  { %603 = vmatpush.bf16.msrb.mxu2 %v982_v0 }
  0x3a   :  { %578 = vmatpush.bf16.msrb.mxu0 %v965_v2 }
  0x3b   :  { %591 = vmatpush.bf16.msrb.mxu1 %v973_v3 }
  0x3c   :  { %604 = vmatpush.bf16.msrb.mxu2 %v981_v4 }
  0x3e   :  { %579 = vmatpush.bf16.msrb.mxu0 %v964_v5 }
  0x3f   :  { %592 = vmatpush.bf16.msrb.mxu1 %v972_v6 }
  0x40   :  { %605 = vmatpush.bf16.msrb.mxu2 %v980_v7 }
  0x41   :  { %580 = vmatmul.bf16.vlgmr.msrb.gmra.mxu0 %v52_v11 }
  0x42   :  { %593 = vmatmul.bf16.vlgmr.msrb.gmra.mxu1 %v53_v12 }
  0x43   :  { %606 = vmatmul.bf16.vlgmr.msrb.gmra.mxu2 %v54_v13 }
  0x9e   :  { %v529_v15 = vpop.f32.mrf.mxu0 }
  0x9f   :  { %v542_v17 = vpop.f32.mrf.mxu1  ;;  %v530_v24 = vadd.f32 %v992_v22, %v529_v15 }
  0xa1   :  { %v543_v26 = vadd.f32 %v542_v17, %v530_v24 }
  0xa6   :  { %v555_v18 = vpop.f32.mrf.mxu2  ;;  %v531_v19 = vpop.f32.mrf.mxu0 }
  0xa7   :  { %v544_v20 = vpop.f32.mrf.mxu1  ;;  %v568_v21 = vpop.f32.mrf.mxu3  ;;  %v556_v27 = vadd.f32 %v555_v18, %v543_v26 }
  0xa9   :  { %v569_v29 = vadd.f32 %v568_v21, %v556_v27 }
  0xae   :  { %v557_v23 = vpop.f32.mrf.mxu2 }
  0xaf   :  { %v570_v25 = vpop.f32.mrf.mxu3 }
  0xb7   :  { %v620_v28 = vpop.f32.mrf.mxu3 }
  0xbe   :  { %v581_v30 = vpop.f32.mrf.mxu0 }
  0xbf   :  { %v594_v31 = vpop.f32.mrf.mxu1  ;;  %v582_v32 = vadd.f32 %v581_v30, %v569_v29  ;;  %v622_v33 = vpop.f32.mrf.mxu3 }
  0xc1   :  { %v595_v34 = vadd.f32 %v594_v31, %v582_v32 }
  0xc6   :  { %v607_v35 = vpop.f32.mrf.mxu2  ;;  %v583_v37 = vpop.f32.mrf.mxu0 }
  0xc7   :  { %v608_v36 = vadd.f32 %v607_v35, %v595_v34  ;;  %v596_v38 = vpop.f32.mrf.mxu1 }
  0xc9   :  { %v621_v39 = vadd.f32 %v620_v28, %v608_v36 }
  0xcb   :  { %v624_v40 = vpack.c.bf16 %v621_v39, %v621_v39 }
  0xcd   :  { %931 = vmatmul.msk.bf16.vlgmr.msra.gmra.mxu3 %vm647_vm2, %v624_v40  ;;  %626 = vst.msk [vmem:[#allocation4] sm:$0x1] %vm625_vm3, %v624_v40 }
  0xce   :  { %v609_v41 = vpop.f32.mrf.mxu2  ;;  %687 = dma.vmem_to_hbm [thread:$0]  %s683_s3, 16, %s685_s23, [#allocation5]  }
 0x150   :  { %v660_v43 = vpop.f32.mrf.mxu3 }
 0x151   :  { %v661_v44 = vadd.f32 %v993_v42, %v660_v43 }
 0x153   :  { %665 = vst.msk [vmem:[#allocation2] sm:$0x3] %vm664_vm4, %v661_v44 }
 0x154   :  { %676 = dma.vmem_to_hbm [thread:$0]  %s672_s26, 32, %s674_s29, [#allocation3]  }
 0x158   :  { %v662_v45 = vpop.f32.mrf.mxu3 }
 0x159   :  { %1042 = dma.done.wait [#allocation3], 32  }
 0x15a   :  { %1043 = vsyncadd [#allocation3], 4294967264 }
 0x15b   :  { %1044 = dma.done.wait [#allocation5], 16  }
 0x15c   :  { %1045 = vsyncadd [#allocation5], 4294967280 }
 0x15d   :  { %696 = vsyncpa [#allocation3], 1 }
 0x15e   :  { %697 = vsyncpa [#allocation5], 1 }

</bundles_post_ra>
